<compile_context>
chip_gen: v7x
topology: tpu7x:2x2x1
jax: 0.10.0
libtpu: 0.0.40
codegen_flags: <defaults>
</compile_context>

<pallas_src>
import math

import jax
import jax.numpy as jnp
from jax.experimental import pallas as pl
from jax.experimental.pallas import tpu as pltpu


# ----------------------------- in-kernel helpers -----------------------------

def _gelu_tanh(x):
    # tanh-form GELU: one EUP tanh + a few VPU muls. |err| vs exact erf-GELU
    # < 3e-3, well inside the validation tolerance.
    c = 0.7978845608028654  # sqrt(2/pi)
    return 0.5 * x * (1.0 + jnp.tanh(c * (x + 0.044715 * (x * x * x))))


# --------------------------------- kernel ------------------------------------

def _make_kernel(h, d_model):
    d_k = d_model // h
    dk_half = d_k // 2
    scale = 1.0 / math.sqrt(dk_half)  # module scales by sqrt(query.size(-1)) = d_k//2
    f32 = jnp.float32
    bf16 = jnp.bfloat16

    def split_heads(x, width):
        # (rows, h*width) -> (h, rows, width); single restructuring per tensor.
        return jnp.stack([x[:, i * width:(i + 1) * width] for i in range(h)], axis=0)

    def kernel(q_ref, k_ref, v_ref,
               wq1, bq1, wq2, bq2,
               wk1, bk1, wk2, bk2,
               wv, bv, wo_h, bo,
               o_ref,
               k3_ref, v3_ref):

        def dot(a, b):
            return jnp.dot(a, b, preferred_element_type=f32)

        # ---- K / V projections: compute once per batch element, keep in VMEM ----
        @pl.when(pl.program_id(1) == 0)
        def _():
            k_in = k_ref[0].astype(bf16)   # (S, D)
            v_in = v_ref[0].astype(bf16)   # (S, D)
            # MLP_k: Linear(D,2D) -> GELU -> Linear(2D, D/2)
            hk = _gelu_tanh(dot(k_in, wk1[...]) + bk1[...])
            k2 = (dot(hk.astype(bf16), wk2[...]) + bk2[...]).astype(bf16)
            # linear_v: Linear(D, D)
            v2 = (dot(v_in, wv[...]) + bv[...]).astype(bf16)
            k3_ref[...] = split_heads(k2, dk_half)   # (h, S, dk/2)
            v3_ref[...] = split_heads(v2, d_k)       # (h, S, dk)

        # ---- Q projection for this query tile ----
        q_in = q_ref[0].astype(bf16)       # (TQ, D)
        hq = _gelu_tanh(dot(q_in, wq1[...]) + bq1[...])
        # fold the 1/sqrt(d_k/2) attention scale into q once (not per (S,S) score mat)
        q2 = ((dot(hq.astype(bf16), wq2[...]) + bq2[...]) * scale).astype(bf16)
        q3 = split_heads(q2, dk_half)      # (h, TQ, dk/2)

        k3 = k3_ref[...]                   # (h, S, dk/2)
        v3 = v3_ref[...]                   # (h, S, dk)

        # ---- Batched attention over the head axis ----
        # TODO(synk): mask (masked_fill) and dropout paths are not implemented;
        # wrapper only supports mask=None / dropout=None.
        s = jnp.einsum('hqe,hke->hqk', q3, k3, preferred_element_type=f32)   # (h,TQ,S)
        s = s - jnp.max(s, axis=-1, keepdims=True)
        e = jnp.exp(s)
        p = e * pl.reciprocal(jnp.sum(e, axis=-1, keepdims=True), approx=True)
        ctx = jnp.einsum('hqk,hkd->hqd', p.astype(bf16), v3,
                         preferred_element_type=f32)                         # (h,TQ,dk)

        # ---- Final Linear(D, D): head-batched against wo_h=(h,d_k,D), sum heads ----
        out_h = jnp.einsum('hqd,hdf->hqf', ctx.astype(bf16), wo_h[...],
                           preferred_element_type=f32)                       # (h,TQ,D)
        o_ref[0] = (jnp.sum(out_h, axis=0) + bo[...]).astype(o_ref.dtype)

    return kernel


# --------------------------------- wrapper -----------------------------------

def multiheaded_feature_self_attention(q_in, k_in, v_in, params, h, tq=None):
    """Forward pass of MultiheadedFeatureSelfAttention (mask=None, dropout=None)."""
    B, S, D = q_in.shape
    (wq1, bq1, wq2, bq2, wk1, bk1, wk2, bk2, wv, bv, wo, bo) = params
    d_k = D // h
    dk_half = d_k // 2

    # Query-tile grid axis; bounds per-step VMEM by the query tile.
    # TODO(synk): for very large S also tile K/V with an online-softmax accumulator
    # instead of holding all keys per step.
    if tq is None:
        tq = S
        for cand in (512, 256, 128):
            if S % cand == 0:
                tq = cand
                break
    assert S % tq == 0
    nq = S // tq

    # Weights stream as bf16 (half the DMA bytes / VMEM residency); biases stay f32.
    as_bf16 = lambda w: w.astype(jnp.bfloat16)
    consts = (as_bf16(wq1), bq1, as_bf16(wq2), bq2,
              as_bf16(wk1), bk1, as_bf16(wk2), bk2,
              as_bf16(wv), bv, as_bf16(wo).reshape(h, d_k, D), bo)

    q_spec = pl.BlockSpec((1, tq, D), lambda b, qi: (b, qi, 0))
    kv_spec = pl.BlockSpec((1, S, D), lambda b, qi: (b, 0, 0))   # DMA elided across qi
    out_spec = pl.BlockSpec((1, tq, D), lambda b, qi: (b, qi, 0))

    def const_spec(a):
        # Constant index_map -> DMA'd once and kept resident across grid steps.
        return pl.BlockSpec(a.shape, lambda b, qi, _n=a.ndim: (0,) * _n)

    return pl.pallas_call(
        _make_kernel(h, D),
        out_shape=jax.ShapeDtypeStruct((B, S, D), jnp.float32),
        grid_spec=pltpu.PrefetchScalarGridSpec(
            num_scalar_prefetch=0,
            grid=(B, nq),
            in_specs=[q_spec, kv_spec, kv_spec] + [const_spec(a) for a in consts],
            out_specs=out_spec,
            scratch_shapes=[pltpu.VMEM((h, S, dk_half), jnp.bfloat16),   # K heads cache
                            pltpu.VMEM((h, S, d_k), jnp.bfloat16)],      # V heads cache
        ),
        compiler_params=pltpu.CompilerParams(
            # qi axis carries the K/V scratch cache -> must stay "arbitrary".
            dimension_semantics=("parallel", "arbitrary")),
    )(q_in, k_in, v_in, *consts)


# ------------------------------ param init -----------------------------------

def init_params(key, d_model):
    """PyTorch-nn.Linear-style uniform init; weights stored as (in, out)."""
    def linear(k, fan_in, fan_out):
        kw, kb = jax.random.split(k)
        bound = 1.0 / math.sqrt(fan_in)
        w = jax.random.uniform(kw, (fan_in, fan_out), jnp.float32, -bound, bound)
        b = jax.random.uniform(kb, (1, fan_out), jnp.float32, -bound, bound)
        return w, b

    keys = jax.random.split(key, 6)
    wq1, bq1 = linear(keys[0], d_model, 2 * d_model)
    wq2, bq2 = linear(keys[1], 2 * d_model, d_model // 2)
    wk1, bk1 = linear(keys[2], d_model, 2 * d_model)
    wk2, bk2 = linear(keys[3], 2 * d_model, d_model // 2)
    wv, bv = linear(keys[4], d_model, d_model)
    wo, bo = linear(keys[5], d_model, d_model)
    return (wq1, bq1, wq2, bq2, wk1, bk1, wk2, bk2, wv, bv, wo, bo)


# ------------------------------ pure-JAX reference ----------------------------

def reference(q_in, k_in, v_in, params, h):
    (wq1, bq1, wq2, bq2, wk1, bk1, wk2, bk2, wv, bv, wo, bo) = params
    B, S, D = q_in.shape
    d_k = D // h

    def mlp(x, w1, b1, w2, b2):
        return jax.nn.gelu(x @ w1 + b1, approximate=False) @ w2 + b2

    q = mlp(q_in, wq1, bq1, wq2, bq2).reshape(B, S, h, d_k // 2).transpose(0, 2, 1, 3)
    k = mlp(k_in, wk1, bk1, wk2, bk2).reshape(B, S, h, d_k // 2).transpose(0, 2, 1, 3)
    v = (v_in @ wv + bv).reshape(B, S, h, d_k).transpose(0, 2, 1, 3)

    scores = jnp.einsum('bhqe,bhke->bhqk', q, k) / math.sqrt(q.shape[-1])
    p = jax.nn.softmax(scores, axis=-1)
    x = jnp.einsum('bhqk,bhkd->bhqd', p, v)
    x = x.transpose(0, 2, 1, 3).reshape(B, S, D)
    return x @ wo + bo


# ----------------------------------- main ------------------------------------

if __name__ == "__main__":
    B, S, d_model, h = 2, 8, 32, 4

    key = jax.random.PRNGKey(0)
    kq, kk, kv, kp = jax.random.split(key, 4)
    q_in = jax.random.normal(kq, (B, S, d_model), jnp.float32)
    k_in = jax.random.normal(kk, (B, S, d_model), jnp.float32)
    v_in = jax.random.normal(kv, (B, S, d_model), jnp.float32)
    params = init_params(kp, d_model)

    out = multiheaded_feature_self_attention(q_in, k_in, v_in, params, h)
    out = jax.block_until_ready(out)

    ref = reference(q_in, k_in, v_in, params, h)
    assert out.shape == (B, S, d_model)
    assert jnp.allclose(out, ref, atol=2e-2, rtol=2e-2), (
        f"max abs diff {jnp.max(jnp.abs(out - ref))}")

    print("KERNEL_OK")
</pallas_src>

<mosaic_0001>
module attributes {stable_mosaic.version = 11 : i64} {
  func.func @kernel(%arg0: i32, %arg1: i32, %arg2: memref<1x8x32xf32, #tpu.memory_space<vmem>>, %arg3: memref<1x8x32xf32, #tpu.memory_space<vmem>>, %arg4: memref<1x8x32xf32, #tpu.memory_space<vmem>>, %arg5: memref<32x64xbf16, #tpu.memory_space<vmem>>, %arg6: memref<1x64xf32, #tpu.memory_space<vmem>>, %arg7: memref<64x16xbf16, #tpu.memory_space<vmem>>, %arg8: memref<1x16xf32, #tpu.memory_space<vmem>>, %arg9: memref<32x64xbf16, #tpu.memory_space<vmem>>, %arg10: memref<1x64xf32, #tpu.memory_space<vmem>>, %arg11: memref<64x16xbf16, #tpu.memory_space<vmem>>, %arg12: memref<1x16xf32, #tpu.memory_space<vmem>>, %arg13: memref<32x32xbf16, #tpu.memory_space<vmem>>, %arg14: memref<1x32xf32, #tpu.memory_space<vmem>>, %arg15: memref<4x8x32xbf16, #tpu.memory_space<vmem>>, %arg16: memref<1x32xf32, #tpu.memory_space<vmem>>, %arg17: memref<1x8x32xf32, #tpu.memory_space<vmem>>, %arg18: memref<4x8x4xbf16, #tpu.memory_space<vmem>>, %arg19: memref<4x8x8xbf16, #tpu.memory_space<vmem>>) attributes {dimension_semantics = [#tpu.dimension_semantics<parallel>, #tpu.dimension_semantics<arbitrary>], iteration_bounds = array<i64: 2, 1>, scalar_prefetch = 0 : i64, scratch_operands = 2 : i64, tpu.core_type = #tpu.core_type<tc>, window_params = [{transform_indices = @transform_0, window_bounds = array<i64: 1, 8, 32>}, {transform_indices = @transform_1, window_bounds = array<i64: 1, 8, 32>}, {transform_indices = @transform_2, window_bounds = array<i64: 1, 8, 32>}, {pipeline_mode = #tpu.pipeline_mode<synchronous>, transform_indices = @transform_3, window_bounds = array<i64: 32, 64>}, {pipeline_mode = #tpu.pipeline_mode<synchronous>, transform_indices = @transform_4, window_bounds = array<i64: 1, 64>}, {pipeline_mode = #tpu.pipeline_mode<synchronous>, transform_indices = @transform_5, window_bounds = array<i64: 64, 16>}, {pipeline_mode = #tpu.pipeline_mode<synchronous>, transform_indices = @transform_6, window_bounds = array<i64: 1, 16>}, {pipeline_mode = #tpu.pipeline_mode<synchronous>, transform_indices = @transform_7, window_bounds = array<i64: 32, 64>}, {pipeline_mode = #tpu.pipeline_mode<synchronous>, transform_indices = @transform_8, window_bounds = array<i64: 1, 64>}, {pipeline_mode = #tpu.pipeline_mode<synchronous>, transform_indices = @transform_9, window_bounds = array<i64: 64, 16>}, {pipeline_mode = #tpu.pipeline_mode<synchronous>, transform_indices = @transform_10, window_bounds = array<i64: 1, 16>}, {pipeline_mode = #tpu.pipeline_mode<synchronous>, transform_indices = @transform_11, window_bounds = array<i64: 32, 32>}, {pipeline_mode = #tpu.pipeline_mode<synchronous>, transform_indices = @transform_12, window_bounds = array<i64: 1, 32>}, {pipeline_mode = #tpu.pipeline_mode<synchronous>, transform_indices = @transform_13, window_bounds = array<i64: 4, 8, 32>}, {pipeline_mode = #tpu.pipeline_mode<synchronous>, transform_indices = @transform_14, window_bounds = array<i64: 1, 32>}, {transform_indices = @transform_15, window_bounds = array<i64: 1, 8, 32>}]} {
    %c0_i32 = arith.constant 0 : i32
    %0 = arith.cmpi eq, %arg1, %c0_i32 : i32
    %1 = arith.extui %0 : i1 to i32
    %c0_i32_0 = arith.constant 0 : i32
    %2 = arith.cmpi ne, %1, %c0_i32_0 : i32
    scf.if %2 {
      %c0_37 = arith.constant 0 : index
      %c0_38 = arith.constant 0 : index
      %c0_39 = arith.constant 0 : index
      %67 = vector.load %arg3[%c0_37, %c0_38, %c0_39] : memref<1x8x32xf32, #tpu.memory_space<vmem>>, vector<1x8x32xf32>
      %68 = vector.shape_cast %67 : vector<1x8x32xf32> to vector<8x32xf32>
      %69 = arith.truncf %68 : vector<8x32xf32> to vector<8x32xbf16>
      %c0_40 = arith.constant 0 : index
      %c0_41 = arith.constant 0 : index
      %c0_42 = arith.constant 0 : index
      %70 = vector.load %arg4[%c0_40, %c0_41, %c0_42] : memref<1x8x32xf32, #tpu.memory_space<vmem>>, vector<1x8x32xf32>
      %71 = vector.shape_cast %70 : vector<1x8x32xf32> to vector<8x32xf32>
      %72 = arith.truncf %71 : vector<8x32xf32> to vector<8x32xbf16>
      %c0_43 = arith.constant 0 : index
      %c0_44 = arith.constant 0 : index
      %73 = vector.load %arg9[%c0_43, %c0_44] : memref<32x64xbf16, #tpu.memory_space<vmem>>, vector<32x64xbf16>
      %cst_45 = arith.constant dense<0.000000e+00> : vector<8x64xf32>
      %74 = tpu.matmul %69, %73, %cst_45 {dimension_numbers = #tpu.dot_dimension_numbers<[1], [0], [0], [1], [0, 0, 1, 1], [], []>} : vector<8x32xbf16>, vector<32x64xbf16>, vector<8x64xf32> -> vector<8x64xf32>
      %c0_46 = arith.constant 0 : index
      %c0_47 = arith.constant 0 : index
      %75 = vector.load %arg10[%c0_46, %c0_47] : memref<1x64xf32, #tpu.memory_space<vmem>>, vector<1x64xf32>
      %76 = vector.broadcast %75 : vector<1x64xf32> to vector<8x64xf32>
      %77 = arith.addf %74, %76 : vector<8x64xf32>
      %cst_48 = arith.constant 5.000000e-01 : f32
      %78 = vector.broadcast %cst_48 : f32 to vector<8x64xf32>
      %79 = arith.mulf %78, %77 : vector<8x64xf32>
      %80 = arith.mulf %77, %77 : vector<8x64xf32>
      %81 = arith.mulf %80, %77 : vector<8x64xf32>
      %cst_49 = arith.constant 4.471500e-02 : f32
      %82 = vector.broadcast %cst_49 : f32 to vector<8x64xf32>
      %83 = arith.mulf %82, %81 : vector<8x64xf32>
      %84 = arith.addf %77, %83 : vector<8x64xf32>
      %cst_50 = arith.constant 0.797884583 : f32
      %85 = vector.broadcast %cst_50 : f32 to vector<8x64xf32>
      %86 = arith.mulf %85, %84 : vector<8x64xf32>
      %87 = math.tanh %86 : vector<8x64xf32>
      %cst_51 = arith.constant 1.000000e+00 : f32
      %88 = vector.broadcast %cst_51 : f32 to vector<8x64xf32>
      %89 = arith.addf %88, %87 : vector<8x64xf32>
      %90 = arith.mulf %79, %89 : vector<8x64xf32>
      %91 = arith.truncf %90 : vector<8x64xf32> to vector<8x64xbf16>
      %c0_52 = arith.constant 0 : index
      %c0_53 = arith.constant 0 : index
      %92 = vector.load %arg11[%c0_52, %c0_53] : memref<64x16xbf16, #tpu.memory_space<vmem>>, vector<64x16xbf16>
      %cst_54 = arith.constant dense<0.000000e+00> : vector<8x16xf32>
      %93 = tpu.matmul %91, %92, %cst_54 {dimension_numbers = #tpu.dot_dimension_numbers<[1], [0], [0], [1], [0, 0, 1, 1], [], []>} : vector<8x64xbf16>, vector<64x16xbf16>, vector<8x16xf32> -> vector<8x16xf32>
      %c0_55 = arith.constant 0 : index
      %c0_56 = arith.constant 0 : index
      %94 = vector.load %arg12[%c0_55, %c0_56] : memref<1x16xf32, #tpu.memory_space<vmem>>, vector<1x16xf32>
      %95 = vector.broadcast %94 : vector<1x16xf32> to vector<8x16xf32>
      %96 = arith.addf %93, %95 : vector<8x16xf32>
      %97 = arith.truncf %96 : vector<8x16xf32> to vector<8x16xbf16>
      %c0_57 = arith.constant 0 : index
      %c0_58 = arith.constant 0 : index
      %98 = vector.load %arg13[%c0_57, %c0_58] : memref<32x32xbf16, #tpu.memory_space<vmem>>, vector<32x32xbf16>
      %cst_59 = arith.constant dense<0.000000e+00> : vector<8x32xf32>
      %99 = tpu.matmul %72, %98, %cst_59 {dimension_numbers = #tpu.dot_dimension_numbers<[1], [0], [0], [1], [0, 0, 1, 1], [], []>} : vector<8x32xbf16>, vector<32x32xbf16>, vector<8x32xf32> -> vector<8x32xf32>
      %c0_60 = arith.constant 0 : index
      %c0_61 = arith.constant 0 : index
      %100 = vector.load %arg14[%c0_60, %c0_61] : memref<1x32xf32, #tpu.memory_space<vmem>>, vector<1x32xf32>
      %101 = vector.broadcast %100 : vector<1x32xf32> to vector<8x32xf32>
      %102 = arith.addf %99, %101 : vector<8x32xf32>
      %103 = arith.truncf %102 : vector<8x32xf32> to vector<8x32xbf16>
      %104 = vector.extract_strided_slice %97 {offsets = [0, 0], sizes = [8, 4], strides = [1, 1]} : vector<8x16xbf16> to vector<8x4xbf16>
      %105 = vector.extract_strided_slice %97 {offsets = [0, 4], sizes = [8, 4], strides = [1, 1]} : vector<8x16xbf16> to vector<8x4xbf16>
      %106 = vector.extract_strided_slice %97 {offsets = [0, 8], sizes = [8, 4], strides = [1, 1]} : vector<8x16xbf16> to vector<8x4xbf16>
      %107 = vector.extract_strided_slice %97 {offsets = [0, 12], sizes = [8, 4], strides = [1, 1]} : vector<8x16xbf16> to vector<8x4xbf16>
      %108 = vector.shape_cast %104 : vector<8x4xbf16> to vector<1x8x4xbf16>
      %109 = vector.shape_cast %105 : vector<8x4xbf16> to vector<1x8x4xbf16>
      %110 = vector.shape_cast %106 : vector<8x4xbf16> to vector<1x8x4xbf16>
      %111 = vector.shape_cast %107 : vector<8x4xbf16> to vector<1x8x4xbf16>
      %112 = tpu.concatenate %108, %109, %110, %111 in 0 : vector<1x8x4xbf16>, vector<1x8x4xbf16>, vector<1x8x4xbf16>, vector<1x8x4xbf16> -> vector<4x8x4xbf16>
      %c0_62 = arith.constant 0 : index
      %c0_63 = arith.constant 0 : index
      %c0_64 = arith.constant 0 : index
      %113 = vector.load %arg18[%c0_62, %c0_63, %c0_64] : memref<4x8x4xbf16, #tpu.memory_space<vmem>>, vector<4x8x4xbf16>
      tpu.vector_store %arg18[%c0_62, %c0_63, %c0_64], %112 {strides = array<i32>} : memref<4x8x4xbf16, #tpu.memory_space<vmem>>, vector<4x8x4xbf16>,
      %114 = vector.extract_strided_slice %103 {offsets = [0, 0], sizes = [8, 8], strides = [1, 1]} : vector<8x32xbf16> to vector<8x8xbf16>
      %115 = vector.extract_strided_slice %103 {offsets = [0, 8], sizes = [8, 8], strides = [1, 1]} : vector<8x32xbf16> to vector<8x8xbf16>
      %116 = vector.extract_strided_slice %103 {offsets = [0, 16], sizes = [8, 8], strides = [1, 1]} : vector<8x32xbf16> to vector<8x8xbf16>
      %117 = vector.extract_strided_slice %103 {offsets = [0, 24], sizes = [8, 8], strides = [1, 1]} : vector<8x32xbf16> to vector<8x8xbf16>
      %118 = vector.shape_cast %114 : vector<8x8xbf16> to vector<1x8x8xbf16>
      %119 = vector.shape_cast %115 : vector<8x8xbf16> to vector<1x8x8xbf16>
      %120 = vector.shape_cast %116 : vector<8x8xbf16> to vector<1x8x8xbf16>
      %121 = vector.shape_cast %117 : vector<8x8xbf16> to vector<1x8x8xbf16>
      %122 = tpu.concatenate %118, %119, %120, %121 in 0 : vector<1x8x8xbf16>, vector<1x8x8xbf16>, vector<1x8x8xbf16>, vector<1x8x8xbf16> -> vector<4x8x8xbf16>
      %c0_65 = arith.constant 0 : index
      %c0_66 = arith.constant 0 : index
      %c0_67 = arith.constant 0 : index
      %123 = vector.load %arg19[%c0_65, %c0_66, %c0_67] : memref<4x8x8xbf16, #tpu.memory_space<vmem>>, vector<4x8x8xbf16>
      tpu.vector_store %arg19[%c0_65, %c0_66, %c0_67], %122 {strides = array<i32>} : memref<4x8x8xbf16, #tpu.memory_space<vmem>>, vector<4x8x8xbf16>,
    } else {
    }
    %c0 = arith.constant 0 : index
    %c0_1 = arith.constant 0 : index
    %c0_2 = arith.constant 0 : index
    %3 = vector.load %arg2[%c0, %c0_1, %c0_2] : memref<1x8x32xf32, #tpu.memory_space<vmem>>, vector<1x8x32xf32>
    %4 = vector.shape_cast %3 : vector<1x8x32xf32> to vector<8x32xf32>
    %5 = arith.truncf %4 : vector<8x32xf32> to vector<8x32xbf16>
    %c0_3 = arith.constant 0 : index
    %c0_4 = arith.constant 0 : index
    %6 = vector.load %arg5[%c0_3, %c0_4] : memref<32x64xbf16, #tpu.memory_space<vmem>>, vector<32x64xbf16>
    %cst = arith.constant dense<0.000000e+00> : vector<8x64xf32>
    %7 = tpu.matmul %5, %6, %cst {dimension_numbers = #tpu.dot_dimension_numbers<[1], [0], [0], [1], [0, 0, 1, 1], [], []>} : vector<8x32xbf16>, vector<32x64xbf16>, vector<8x64xf32> -> vector<8x64xf32>
    %c0_5 = arith.constant 0 : index
    %c0_6 = arith.constant 0 : index
    %8 = vector.load %arg6[%c0_5, %c0_6] : memref<1x64xf32, #tpu.memory_space<vmem>>, vector<1x64xf32>
    %9 = vector.broadcast %8 : vector<1x64xf32> to vector<8x64xf32>
    %10 = arith.addf %7, %9 : vector<8x64xf32>
    %cst_7 = arith.constant 5.000000e-01 : f32
    %11 = vector.broadcast %cst_7 : f32 to vector<8x64xf32>
    %12 = arith.mulf %11, %10 : vector<8x64xf32>
    %13 = arith.mulf %10, %10 : vector<8x64xf32>
    %14 = arith.mulf %13, %10 : vector<8x64xf32>
    %cst_8 = arith.constant 4.471500e-02 : f32
    %15 = vector.broadcast %cst_8 : f32 to vector<8x64xf32>
    %16 = arith.mulf %15, %14 : vector<8x64xf32>
    %17 = arith.addf %10, %16 : vector<8x64xf32>
    %cst_9 = arith.constant 0.797884583 : f32
    %18 = vector.broadcast %cst_9 : f32 to vector<8x64xf32>
    %19 = arith.mulf %18, %17 : vector<8x64xf32>
    %20 = math.tanh %19 : vector<8x64xf32>
    %cst_10 = arith.constant 1.000000e+00 : f32
    %21 = vector.broadcast %cst_10 : f32 to vector<8x64xf32>
    %22 = arith.addf %21, %20 : vector<8x64xf32>
    %23 = arith.mulf %12, %22 : vector<8x64xf32>
    %24 = arith.truncf %23 : vector<8x64xf32> to vector<8x64xbf16>
    %c0_11 = arith.constant 0 : index
    %c0_12 = arith.constant 0 : index
    %25 = vector.load %arg7[%c0_11, %c0_12] : memref<64x16xbf16, #tpu.memory_space<vmem>>, vector<64x16xbf16>
    %cst_13 = arith.constant dense<0.000000e+00> : vector<8x16xf32>
    %26 = tpu.matmul %24, %25, %cst_13 {dimension_numbers = #tpu.dot_dimension_numbers<[1], [0], [0], [1], [0, 0, 1, 1], [], []>} : vector<8x64xbf16>, vector<64x16xbf16>, vector<8x16xf32> -> vector<8x16xf32>
    %c0_14 = arith.constant 0 : index
    %c0_15 = arith.constant 0 : index
    %27 = vector.load %arg8[%c0_14, %c0_15] : memref<1x16xf32, #tpu.memory_space<vmem>>, vector<1x16xf32>
    %28 = vector.broadcast %27 : vector<1x16xf32> to vector<8x16xf32>
    %29 = arith.addf %26, %28 : vector<8x16xf32>
    %cst_16 = arith.constant 5.000000e-01 : f32
    %30 = vector.broadcast %cst_16 : f32 to vector<8x16xf32>
    %31 = arith.mulf %29, %30 : vector<8x16xf32>
    %32 = arith.truncf %31 : vector<8x16xf32> to vector<8x16xbf16>
    %33 = vector.extract_strided_slice %32 {offsets = [0, 0], sizes = [8, 4], strides = [1, 1]} : vector<8x16xbf16> to vector<8x4xbf16>
    %34 = vector.extract_strided_slice %32 {offsets = [0, 4], sizes = [8, 4], strides = [1, 1]} : vector<8x16xbf16> to vector<8x4xbf16>
    %35 = vector.extract_strided_slice %32 {offsets = [0, 8], sizes = [8, 4], strides = [1, 1]} : vector<8x16xbf16> to vector<8x4xbf16>
    %36 = vector.extract_strided_slice %32 {offsets = [0, 12], sizes = [8, 4], strides = [1, 1]} : vector<8x16xbf16> to vector<8x4xbf16>
    %37 = vector.shape_cast %33 : vector<8x4xbf16> to vector<1x8x4xbf16>
    %38 = vector.shape_cast %34 : vector<8x4xbf16> to vector<1x8x4xbf16>
    %39 = vector.shape_cast %35 : vector<8x4xbf16> to vector<1x8x4xbf16>
    %40 = vector.shape_cast %36 : vector<8x4xbf16> to vector<1x8x4xbf16>
    %41 = tpu.concatenate %37, %38, %39, %40 in 0 : vector<1x8x4xbf16>, vector<1x8x4xbf16>, vector<1x8x4xbf16>, vector<1x8x4xbf16> -> vector<4x8x4xbf16>
    %c0_17 = arith.constant 0 : index
    %c0_18 = arith.constant 0 : index
    %c0_19 = arith.constant 0 : index
    %42 = vector.load %arg18[%c0_17, %c0_18, %c0_19] : memref<4x8x4xbf16, #tpu.memory_space<vmem>>, vector<4x8x4xbf16>
    %c0_20 = arith.constant 0 : index
    %c0_21 = arith.constant 0 : index
    %c0_22 = arith.constant 0 : index
    %43 = vector.load %arg19[%c0_20, %c0_21, %c0_22] : memref<4x8x8xbf16, #tpu.memory_space<vmem>>, vector<4x8x8xbf16>
    "tpu.trace_start"() <{level = 10 : i32, message = "hqe,hke->hqk"}> : () -> ()
    %cst_23 = arith.constant dense<0.000000e+00> : vector<4x8x8xf32>
    %44 = tpu.matmul %41, %42, %cst_23 {dimension_numbers = #tpu.dot_dimension_numbers<[2], [2], [1], [1], [0, 0, 0, 1, 1, 1], [0], [0]>} : vector<4x8x4xbf16>, vector<4x8x4xbf16>, vector<4x8x8xf32> -> vector<4x8x8xf32>
    "tpu.trace_stop"() : () -> ()
    %cst_24 = arith.constant dense<0xFF800000> : vector<4x8xf32>
    %45 = vector.multi_reduction <maximumf>, %44, %cst_24 [2] : vector<4x8x8xf32> to vector<4x8xf32>
    %46 = vector.shape_cast %45 : vector<4x8xf32> to vector<4x8x1xf32>
    %47 = vector.broadcast %46 : vector<4x8x1xf32> to vector<4x8x8xf32>
    %48 = arith.subf %44, %47 : vector<4x8x8xf32>
    %49 = math.exp %48 : vector<4x8x8xf32>
    %cst_25 = arith.constant dense<0.000000e+00> : vector<4x8xf32>
    %50 = vector.multi_reduction <add>, %49, %cst_25 [2] : vector<4x8x8xf32> to vector<4x8xf32>
    %51 = vector.shape_cast %50 : vector<4x8xf32> to vector<4x8x1xf32>
    %52 = tpu.reciprocal %51 {approx = true} : vector<4x8x1xf32> -> vector<4x8x1xf32>
    %53 = vector.broadcast %52 : vector<4x8x1xf32> to vector<4x8x8xf32>
    %54 = arith.mulf %49, %53 : vector<4x8x8xf32>
    %55 = arith.truncf %54 : vector<4x8x8xf32> to vector<4x8x8xbf16>
    "tpu.trace_start"() <{level = 10 : i32, message = "hqk,hkd->hqd"}> : () -> ()
    %cst_26 = arith.constant dense<0.000000e+00> : vector<4x8x8xf32>
    %56 = tpu.matmul %55, %43, %cst_26 {dimension_numbers = #tpu.dot_dimension_numbers<[2], [1], [1], [2], [0, 0, 0, 1, 1, 2], [0], [0]>} : vector<4x8x8xbf16>, vector<4x8x8xbf16>, vector<4x8x8xf32> -> vector<4x8x8xf32>
    "tpu.trace_stop"() : () -> ()
    %57 = arith.truncf %56 : vector<4x8x8xf32> to vector<4x8x8xbf16>
    %c0_27 = arith.constant 0 : index
    %c0_28 = arith.constant 0 : index
    %c0_29 = arith.constant 0 : index
    %58 = vector.load %arg15[%c0_27, %c0_28, %c0_29] : memref<4x8x32xbf16, #tpu.memory_space<vmem>>, vector<4x8x32xbf16>
    "tpu.trace_start"() <{level = 10 : i32, message = "hqd,hdf->hqf"}> : () -> ()
    %cst_30 = arith.constant dense<0.000000e+00> : vector<4x8x32xf32>
    %59 = tpu.matmul %57, %58, %cst_30 {dimension_numbers = #tpu.dot_dimension_numbers<[2], [1], [1], [2], [0, 0, 0, 1, 1, 2], [0], [0]>} : vector<4x8x8xbf16>, vector<4x8x32xbf16>, vector<4x8x32xf32> -> vector<4x8x32xf32>
    "tpu.trace_stop"() : () -> ()
    %cst_31 = arith.constant dense<0.000000e+00> : vector<8x32xf32>
    %60 = vector.multi_reduction <add>, %59, %cst_31 [0] : vector<4x8x32xf32> to vector<8x32xf32>
    %c0_32 = arith.constant 0 : index
    %c0_33 = arith.constant 0 : index
    %61 = vector.load %arg16[%c0_32, %c0_33] : memref<1x32xf32, #tpu.memory_space<vmem>>, vector<1x32xf32>
    %62 = vector.broadcast %61 : vector<1x32xf32> to vector<8x32xf32>
    %63 = arith.addf %60, %62 : vector<8x32xf32>
    %c0_34 = arith.constant 0 : index
    %c0_35 = arith.constant 0 : index
    %c0_36 = arith.constant 0 : index
    %64 = vector.load %arg17[%c0_34, %c0_35, %c0_36] : memref<1x8x32xf32, #tpu.memory_space<vmem>>, vector<1x8x32xf32>
    %65 = vector.shape_cast %64 : vector<1x8x32xf32> to vector<8x32xf32>
    %66 = vector.shape_cast %63 : vector<8x32xf32> to vector<1x8x32xf32>
    tpu.vector_store %arg17[%c0_34, %c0_35, %c0_36], %66 {strides = array<i32>} : memref<1x8x32xf32, #tpu.memory_space<vmem>>, vector<1x8x32xf32>,
    return
  }
  func.func @transform_0(%arg0: i32, %arg1: i32) -> (i32, i32, i32) {
    %c0_i32 = arith.constant 0 : i32
    %c0_i32_0 = arith.constant 0 : i32
    return %arg0, %arg1, %c0_i32 : i32, i32, i32
  }
  func.func @transform_1(%arg0: i32, %arg1: i32) -> (i32, i32, i32) {
    %c0_i32 = arith.constant 0 : i32
    %c0_i32_0 = arith.constant 0 : i32
    %c0_i32_1 = arith.constant 0 : i32
    return %arg0, %c0_i32, %c0_i32_0 : i32, i32, i32
  }
  func.func @transform_2(%arg0: i32, %arg1: i32) -> (i32, i32, i32) {
    %c0_i32 = arith.constant 0 : i32
    %c0_i32_0 = arith.constant 0 : i32
    %c0_i32_1 = arith.constant 0 : i32
    return %arg0, %c0_i32, %c0_i32_0 : i32, i32, i32
  }
  func.func @transform_3(%arg0: i32, %arg1: i32) -> (i32, i32) {
    %c0_i32 = arith.constant 0 : i32
    %c0_i32_0 = arith.constant 0 : i32
    %c0_i32_1 = arith.constant 0 : i32
    return %c0_i32, %c0_i32_0 : i32, i32
  }
  func.func @transform_4(%arg0: i32, %arg1: i32) -> (i32, i32) {
    %c0_i32 = arith.constant 0 : i32
    %c0_i32_0 = arith.constant 0 : i32
    %c0_i32_1 = arith.constant 0 : i32
    return %c0_i32, %c0_i32_0 : i32, i32
  }
  func.func @transform_5(%arg0: i32, %arg1: i32) -> (i32, i32) {
    %c0_i32 = arith.constant 0 : i32
    %c0_i32_0 = arith.constant 0 : i32
    %c0_i32_1 = arith.constant 0 : i32
    return %c0_i32, %c0_i32_0 : i32, i32
  }
  func.func @transform_6(%arg0: i32, %arg1: i32) -> (i32, i32) {
    %c0_i32 = arith.constant 0 : i32
    %c0_i32_0 = arith.constant 0 : i32
    %c0_i32_1 = arith.constant 0 : i32
    return %c0_i32, %c0_i32_0 : i32, i32
  }
  func.func @transform_7(%arg0: i32, %arg1: i32) -> (i32, i32) {
    %c0_i32 = arith.constant 0 : i32
    %c0_i32_0 = arith.constant 0 : i32
    %c0_i32_1 = arith.constant 0 : i32
    return %c0_i32, %c0_i32_0 : i32, i32
  }
  func.func @transform_8(%arg0: i32, %arg1: i32) -> (i32, i32) {
    %c0_i32 = arith.constant 0 : i32
    %c0_i32_0 = arith.constant 0 : i32
    %c0_i32_1 = arith.constant 0 : i32
    return %c0_i32, %c0_i32_0 : i32, i32
  }
  func.func @transform_9(%arg0: i32, %arg1: i32) -> (i32, i32) {
    %c0_i32 = arith.constant 0 : i32
    %c0_i32_0 = arith.constant 0 : i32
    %c0_i32_1 = arith.constant 0 : i32
    return %c0_i32, %c0_i32_0 : i32, i32
  }
  func.func @transform_10(%arg0: i32, %arg1: i32) -> (i32, i32) {
    %c0_i32 = arith.constant 0 : i32
    %c0_i32_0 = arith.constant 0 : i32
    %c0_i32_1 = arith.constant 0 : i32
    return %c0_i32, %c0_i32_0 : i32, i32
  }
  func.func @transform_11(%arg0: i32, %arg1: i32) -> (i32, i32) {
    %c0_i32 = arith.constant 0 : i32
    %c0_i32_0 = arith.constant 0 : i32
    %c0_i32_1 = arith.constant 0 : i32
    return %c0_i32, %c0_i32_0 : i32, i32
  }
  func.func @transform_12(%arg0: i32, %arg1: i32) -> (i32, i32) {
    %c0_i32 = arith.constant 0 : i32
    %c0_i32_0 = arith.constant 0 : i32
    %c0_i32_1 = arith.constant 0 : i32
    return %c0_i32, %c0_i32_0 : i32, i32
  }
  func.func @transform_13(%arg0: i32, %arg1: i32) -> (i32, i32, i32) {
    %c0_i32 = arith.constant 0 : i32
    %c0_i32_0 = arith.constant 0 : i32
    %c0_i32_1 = arith.constant 0 : i32
    %c0_i32_2 = arith.constant 0 : i32
    return %c0_i32, %c0_i32_0, %c0_i32_1 : i32, i32, i32
  }
  func.func @transform_14(%arg0: i32, %arg1: i32) -> (i32, i32) {
    %c0_i32 = arith.constant 0 : i32
    %c0_i32_0 = arith.constant 0 : i32
    %c0_i32_1 = arith.constant 0 : i32
    return %c0_i32, %c0_i32_0 : i32, i32
  }
  func.func @transform_15(%arg0: i32, %arg1: i32) -> (i32, i32, i32) {
    %c0_i32 = arith.constant 0 : i32
    %c0_i32_0 = arith.constant 0 : i32
    return %arg0, %arg1, %c0_i32 : i32, i32, i32
  }
}

</mosaic_0001>

<bundles_post_ra>
// kernel: tpu_custom_call.1
= control target key start
LH: loop header
LB: loop body
LE: loop exit
PB: predicated region body
PF: predicated region fallthrough
CT: control target
= control target key end

     0   :  { %20 = vsyncpa [#allocation5], 0  ;;  %s2624_s0 = inlined_call_operand.vmem [shape: f32[2,8,32], index: 0, kind: input, shape index: {}]   ;;  %s2625_s1 = inlined_call_operand.vmem [shape: f32[2,8,32], index: 1, kind: input, shape index: {}]   ;;  %s2626_s2 = inlined_call_operand.vmem [shape: f32[2,8,32], index: 2, kind: input, shape index: {}]   ;;  %s2627_s3 = inlined_call_operand.vmem [shape: bf16[32,64], index: 3, kind: input, shape index: {}]   ;;  %s2628_s4 = inlined_call_operand.vmem [shape: f32[1,64], index: 4, kind: input, shape index: {}]   ;;  %s2629_s5 = inlined_call_operand.vmem [shape: bf16[64,16], index: 5, kind: input, shape index: {}]   ;;  %s2630_s6 = inlined_call_operand.vmem [shape: f32[1,16], index: 6, kind: input, shape index: {}]   ;;  %s2631_s7 = inlined_call_operand.vmem [shape: bf16[32,64], index: 7, kind: input, shape index: {}]   ;;  %s2632_s8 = inlined_call_operand.hbm [shape: f32[1,64], index: 8, kind: input, shape index: {}]   ;;  %s2633_s9 = inlined_call_operand.vmem [shape: bf16[64,16], index: 9, kind: input, shape index: {}]   ;;  %s2634_s10 = inlined_call_operand.vmem [shape: f32[1,16], index: 10, kind: input, shape index: {}]   ;;  %s2635_s11 = inlined_call_operand.vmem [shape: bf16[32,32], index: 11, kind: input, shape index: {}]   ;;  %s2636_s12 = inlined_call_operand.vmem [shape: f32[1,32], index: 12, kind: input, shape index: {}]   ;;  %s2637_s13 = inlined_call_operand.vmem [shape: bf16[4,8,32], index: 13, kind: input, shape index: {}]   ;;  %s2638_s14 = inlined_call_operand.vmem [shape: f32[1,32], index: 14, kind: input, shape index: {}]   ;;  %s2639_s15 = inlined_call_operand.hbm [shape: f32[2,8,32], index: 15, kind: output, shape index: {}]  }
   0x1   :  { %21 = vsyncpa [#allocation6], 0 }
   0x2   :  { %23 = vsyncpa [#allocation6 + $0x1], 0  ;;  %s2280_s18 = smov 0   ;;  %s2282_s19 = smov 0  }
   0x3   :  { %s2284_s20 = smov 0   ;;  %s2286_s21 = smov 0  }
   0x4   :  { %s2288_s22 = smov 0   ;;  %s2290_s23 = smov 0  }
   0x5 LB: > { %2651 = sst [smem:[#allocation10_spill]] %s2169_s18  ;;  %s1757_s24 = sadd.s32 4294967295, %s2189_s23   ;;  %s2189_s23 = sphi %s2290_s23, %s29_s23   ;;  %s2185_s22 = sphi %s2288_s22, %s2673_s22   ;;  %s2181_s21 = sphi %s2286_s21, %s2672_s21   ;;  %s2177_s20 = sphi %s2284_s20, %s2671_s20   ;;  %s2173_s19 = sphi %s2282_s19, %s2675_s19   ;;  %s2169_s18 = sphi %s2280_s18, %s2674_s18  }
   0x6   : > { %2652 = sst [smem:[#allocation11_spill]] %s2177_s20  ;;  %s1758_s25 = sadd.s32 4294967294, %s2189_s23  }
   0x7   : > { %2653 = sst [smem:[#allocation12_spill]] %s2185_s22  ;;  %s41_s26 = sadd.s32 1, %s2185_s22 }
   0x8   : > { %2654 = sst [smem:[#allocation13_spill]] %s2189_s23  ;;  %s382_s27 = sadd.s32 1, %s2177_s20 }
   0x9   : > { %p43_p0 = scmp.ge.s32.totalorder %s41_s26, 2  ;;  %p392_p1 = scmp.ne.s32.totalorder %s2177_s20, %s2173_s19 }
   0xa   : > { %p393_p2 = scmp.eq.s32.totalorder %s1757_s24, 1  ;;  %p398_p3 = scmp.ne.s32.totalorder %s2173_s19, %s2169_s18 }
   0xb   : > { %s2677_s26 = smov (%p43_p0, %s41_s26), 0  ;;  %p399_p5 = scmp.eq.s32.totalorder %s1758_s25, 1 }
   0xc   : > { %2655 = sst [smem:[#allocation14_spill]] %s2677_s26  ;;  %p2320_p4 = por %p393_p2, %p392_p1 }
   0xd   : > { %s377_s29 = ssub.s32 %s2185_s22, %s2677_s26  ;;  %p1759_p6 = scmp.ge.s32.totalorder %s2189_s23, 1 }
   0xe   : > { %s2656_s28 = scalar_select %p2320_p4, 1, 0 }
   0xf   : > { %p380_p7 = scmp.eq.s32.totalorder %s377_s29, 0  ;;  %p2327_p8 = por %p399_p5, %p398_p3 }
  0x10   : > { %p406_p9 = scmp.lt.s32.totalorder %s2189_s23, 3  ;;  %p2339_p11 = scmp.eq.s32.totalorder %s1757_s24, 0 }
  0x11   : > { %s2657_s30 = scalar_select %p2327_p8, 1, 0 }
  0x12   : > { %s2333_s16 = scalar_select %p380_p7, %s2177_s20, %s382_s27  }
  0x13   : > { %2658 = sst [smem:[#allocation15_spill]] %s2657_s30  ;;  %p2335_p10 = pnand %p1759_p6, %p406_p9 }
  0x14   : > { %2659 = sst [smem:[#allocation16_spill]] %s2333_s16  ;;  %s2191_s25 = smov [#allocation4]  }
  0x15   : > { %s2660_s17 = scalar_select %p2335_p10, 1, 0 }
  0x16   : > { %s2661_s18 = scalar_select %p2339_p11, 1, 0 }
  0x17   : > { %p1978_p12 = pneg %p2335_p10  ;;  %s434_s29 = sshll.u32 %s2191_s25, 4  ;;  %s435_s29 = int_to_ptr.vmem [resolvable:$true] %s434_s29 }
  0x18   : > { %s2079_s16 = scalar_lea.hbm %s2632_s8, 16 }
  0x19   : > { %p2347_p13 = pnand %p2339_p11, %p1978_p12  ;;  %p2080_p0 = scmp.ne.s32.totalorder %s2632_s8, %s2079_s16 }
  0x1a   : > { %p2086_p5 = scmp.lt.u32.totalorder %s2079_s16, %s2632_s8 }
  0x1b   : > { %p2081_p1 = pneg %p2347_p13 }
  0x1d   : > { %p2082_p2 = pnand %p2081_p1, %p2080_p0 }
  0x1f   : > { %p2083_p3 = pneg %p2082_p2 }
  0x21   : > { %p2088_p6 = pnand %p2086_p5, %p2083_p3 }
  0x23   : > { %2091 = shalt.err (!%p2088_p6)
}
  0x24   : > { %s2092_s23 = scalar_lea.vmem %s435_s29, 16  ;;  %s2099_s22 = scalar_lea.vmem %s435_s29, 32 }
  0x25   : > { %p2093_p7 = scmp.ne.s32.totalorder %s435_s29, %s2092_s23  ;;  %p2100_p8 = scmp.lt.s32.totalorder %s435_s29, %s435_s29 }
  0x26   : > { %p2101_p4 = scmp.lt.s32.totalorder %s2099_s22, %s2092_s23 }
  0x27   : > { %p2095_p9 = pnand %p2093_p7, %p2081_p1 }
  0x28   : > { %p2102_p11 = por %p2101_p4, %p2100_p8 }
  0x29   : > { %p2096_p12 = pneg %p2095_p9 }
  0x2b   : > { %p2103_p10 = pnand %p2102_p11, %p2096_p12 }
  0x2d   : > { %2106 = shalt.err (!%p2103_p10)
}
  0x2e   : > { %1981 = dma.hbm_to_vmem [thread:$0]  (!%p2347_p13), %s2632_s8, 16, %s435_s29, [#allocation5]  }
  0x2f   : > { %p2663_p0 = scmp.ne.s32.totalorder %s2660_s17, 0 }
  0x30   : > { %p2664_p2 = scmp.ne.s32.totalorder (!%p2663_p0), %s2661_s18, 0 }
  0x31   : > { %489 = sbr.rel (%p2663_p0) target bundleno = 1641 (0x669), region = 80 }
  0x38   : > { %2160 = dma.done.wait (%p2664_p2), [#allocation5], 16  }
  0x39   : > { %2162 = vsyncadd (%p2664_p2), [#allocation5], 4294967280  ;;  %p547_p4 = scmp.lt.s32.totalorder %s2181_s21, 1  ;;  %v2192_v0 = vmov 0.0   ;;  %vm2193_vm0 = vmmov 0   ;;  %v2045_v1 = vld [vmem:[%s2631_s7] sm:$0xff]  }
  0x3a   : > { %1852 = vmatprep.subr.bf16.mxu0 %v2192_v0  ;;  %1856 = vmatprep.mubr.msk.bf16.mxu0 %vm2193_vm0, %v2192_v0  ;;  %v2046_v2 = vld [vmem:[%s2631_s7 + $0x8] sm:$0xff]   ;;  %vm594_vm1 = vcmask 261120   ;;  %v2047_v5 = vld [vmem:[%s2635_s11] sm:$0xff]   ;;  %v2053_v15 = vld [vmem:[%s2633_s9 + $0x10] sm:$0xff]   ;;  %vm824_vm2 = vcmask 60416   ;;  %vm687_vm3 = vcmask 523264  }
  0x3b   : > { %s548_s23 = scalar_select %p547_p4, %s2181_s21, 1  ;;  %1860 = vmatprep.subr.bf16.mxu1 %v2192_v0  ;;  %1868 = vmatprep.mubr.msk.bf16.mxu1 %vm2193_vm0, %v2192_v0  ;;  %v2048_v6 = vld [vmem:[%s2635_s11 + $0x8] sm:$0xff]   ;;  %v2049_v9 = vld [vmem:[%s2627_s3] sm:$0xff]   ;;  %v2054_v16 = vld [vmem:[%s2633_s9 + $0x18] sm:$0xff]   ;;  %vm809_vm4 = vcmask 27648   ;;  %vm1008_vm5 = vcmask 31744  }
  0x3c   : > { %1853 = vmatpush3.bf16.msra.mxu0 %v2045_v1  ;;  %v2050_v10 = vld [vmem:[%s2627_s3 + $0x8] sm:$0xff]   ;;  %v2051_v13 = vld [vmem:[%s2633_s9] sm:$0xff]   ;;  %v2057_v53 = vld [vmem:[%s2629_s5 + $0x10] sm:$0xff]   ;;  %s2194_s20 = smov 116   ;;  %vm1245_vm6 = vcmask 1043456   ;;  %vm1193_vm7 = vcmask 64512  }
  0x3d   : > { %s1765_s26 = sshll.u32 %s548_s23, 3  ;;  %1854 = vmatprep.subr.bf16.mxu0 %v2192_v0  ;;  %1861 = vmatpush3.bf16.msra.mxu1 %v2051_v13  ;;  %v2052_v14 = vld [vmem:[%s2633_s9 + $0x8] sm:$0xff]   ;;  %v1768_v17 = vld [vmem:[#allocation4] ss:$0 sm:$0xff]  ;;  %v2058_v55 = vld [vmem:[%s2629_s5 + $0x18] sm:$0xff]   ;;  %s2197_s18 = smov 104  }
  0x3e   : > { %s557_s16 = scalar_lea.vmem %s2625_s1, %s1765_s26  ;;  %s561_s27 = scalar_lea.vmem %s2626_s2, %s1765_s26  ;;  %1862 = vmatprep.subr.bf16.mxu1 %v2192_v0  ;;  %v1778_v25 = vld [vmem:[%s2636_s12] ss:$0 sm:$0xff]  ;;  %v2056_v52 = vld [vmem:[%s2629_s5 + $0x8] sm:$0xff]  }
  0x3f   : > { %v567_v3 = vld [vmem:[%s557_s16] sm:$0xff]  ;;  %s553_s22 = scalar_lea.vmem %s2624_s0, %s1765_s26  ;;  %s2196_s26 = smov 120  }
  0x40   : > { %v568_v4 = vpack.c.bf16 %v567_v3, %v567_v3  ;;  %1855 = vmatpush3.bf16.msra.mxu0 %v2046_v2  ;;  %v569_v7 = vld [vmem:[%s561_s27] sm:$0xff]  ;;  %s2195_s27 = smov 124   ;;  %s2198_s17 = smov 112  }
  0x41   : > { %1872 = vmatprep.subr.bf16.mxu0 %v2192_v0  ;;  %v570_v8 = vpack.c.bf16 %v569_v7, %v569_v7  ;;  %v829_v11 = vld [vmem:[%s553_s22] sm:$0xff]  ;;  %1863 = vmatpush3.bf16.msra.mxu1 %v2052_v14  ;;  %s544_s23 = sand.u32 1, %s2173_s19   ;;  %s1806_s16 = sshll.u32 %s2181_s21, 7 }
  0x42   : > { %v830_v12 = vpack.c.bf16 %v829_v11, %v829_v11  ;;  %1864 = vmatprep.subr.bf16.mxu1 %v2192_v0  ;;  %v1782_v35 = vld [vmem:[%s2628_s4] ss:$0 sm:$0xff]  ;;  %s1764_s30 = sshll.u32 %s544_s23, 3  ;;  %p2665_p10 = scmp.ne.s32.totalorder %s2656_s28, 0 }
  0x43   : > { %1857 = vmatmul.mubr.msk.bf16.vlgmr.msra.gmra.mrb[0].mxu0 %vm594_vm1, %v568_v4  ;;  %v2055_v50 = vld [vmem:[%s2629_s5] sm:$0xff]   ;;  %s546_s29 = scalar_lea.vmem [#allocation7], %s1764_s30  ;;  %s2199_s21 = smov [#allocation7]  }
  0x44   : > { %1873 = vmatpush3.bf16.msra.mxu0 %v2047_v5  ;;  %1876 = vmatprep.mubr.msk.bf16.mxu0 %vm2193_vm0, %v2192_v0  ;;  %v1772_v60 = vld [vmem:[%s2634_s10] ss:$0 sm:$0xff]  ;;  %s1650_s24 = sshll.u32 %s546_s29, 4  ;;  %s2111_s30 = sshll.u32 %s2199_s21, 4  ;;  %s2578_s24 = int_to_ptr.vmem [resolvable:$true] %s1650_s24  ;;  %s2112_s30 = int_to_ptr.vmem [resolvable:$false] %s2111_s30 }
  0x45   : > { %1874 = vmatprep.subr.bf16.mxu0 %v2192_v0  ;;  %1865 = vmatpush3.bf16.msra.mxu1 %v2053_v15  ;;  %p2114_p1 = scmp.lt.s32.totalorder %s2578_s24, %s2112_s30 }
  0x46   : > { %1866 = vmatprep.subr.bf16.mxu1 %v2192_v0 }
  0x48   : > { %1875 = vmatpush3.bf16.msra.mxu0 %v2048_v6  ;;  %v1786_v6 = vld [vmem:[%s2630_s6] ss:$0 sm:$0xff] }
  0x49   : > { %1880 = vmatprep.subr.bf16.mxu0 %v2192_v0  ;;  %1867 = vmatpush3.bf16.msra.mxu1 %v2054_v16 }
  0x4a   : > { %1888 = vmatprep.subr.bf16.mxu1 %v2192_v0 }
  0x4b   : > { %1877 = vmatmul.mubr.msk.bf16.vlgmr.msra.gmra.mrb[4].mxu0 %vm594_vm1, %v570_v8 }
  0x4c   : > { %1881 = vmatpush3.bf16.msra.mxu0 %v2049_v9  ;;  %1884 = vmatprep.mubr.msk.bf16.mxu0 %vm2193_vm0, %v2192_v0 }
  0x4d   : > { %1882 = vmatprep.subr.bf16.mxu0 %v2192_v0 }
  0x50   : > { %1883 = vmatpush3.bf16.msra.mxu0 %v2050_v10 }
  0x51   : > { %1900 = vmatprep.subr.bf16.mxu0 %v2192_v0 }
  0x53   : > { %1885 = vmatmul.mubr.msk.bf16.vlgmr.msra.gmra.mrb[8].mxu0 %vm594_vm1, %v830_v12 }
  0x54   : > { %1902 = vmatprep.mubr.msk.bf16.mxu0 %vm2193_vm0, %v2192_v0 }
 0x116   : > { %v632_v18 = vpop.f32.mrb[0].mxu0 }
 0x117   : > { %v633_v19 = vadd.f32 %v1768_v17, %v632_v18  ;;  %v1858_v20 = vpop.f32.mrb[1].mxu0 }
 0x118   : > { %v635_v21 = vpop.f32.mrb[2].mxu0 }
 0x119   : > { %v639_v22 = vmul.f32 %v633_v19, %v633_v19  ;;  %v1859_v23 = vpop.f32.mrb[3].mxu0  ;;  %v638_v45 = vmul.f32 0.5, %v633_v19 }
 0x11b   : > { %v640_v24 = vmul.f32 %v639_v22, %v633_v19 }
 0x11d   : > { %v641_v26 = vmul.f32 0.044715, %v640_v24 }
 0x11e   : > { %v792_v27 = vpop.f32.mrb[4].mxu0 }
 0x11f   : > { %v642_v28 = vadd.f32 %v641_v26, %v633_v19  ;;  %v793_v29 = vadd.f32 %v1778_v25, %v792_v27  ;;  %v1878_v30 = vpop.f32.mrb[5].mxu0 }
 0x120   : > { %v795_v31 = vpop.f32.mrb[6].mxu0 }
 0x121   : > { %v643_v32 = vmul.f32 0.7978846, %v642_v28  ;;  %v2442_v33 = vpack.c.bf16 %v793_v29, %v793_v29  ;;  %v1879_v34 = vpop.f32.mrb[7].mxu0 }
 0x123   : > { %2059 = vtanh.f32 %v643_v32  ;;  %825 = vst.msk [vmem:[#allocation3] sm:$0xf] %vm824_vm2, %v2442_v33 }
 0x126   : > { %v892_v36 = vpop.f32.mrb[8].mxu0 }
 0x127   : > { %v893_v37 = vadd.f32 %v1782_v35, %v892_v36  ;;  %v1886_v38 = vpop.f32.mrb[9].mxu0 }
 0x128   : > { %v895_v39 = vpop.f32.mrb[10].mxu0 }
 0x129   : > { %v899_v40 = vmul.f32 %v893_v37, %v893_v37  ;;  %v1887_v41 = vpop.f32.mrb[11].mxu0  ;;  %v898_v56 = vmul.f32 0.5, %v893_v37 }
 0x12a   : > { %v1004_v23 = vld [vmem:[#allocation3] sm:$0xf] }
 0x12b   : > { %v900_v42 = vmul.f32 %v899_v40, %v893_v37  ;;  %v1247_v26 = vsel %vm1245_vm6, %v1004_v23, 0 }
 0x12d   : > { %v2060_v43 = vpop.eup %2059  ;;  %v901_v44 = vmul.f32 0.044715, %v900_v42 }
 0x12e   : > { %v645_v46 = vadd.f32 1.0, %v2060_v43 }
 0x12f   : > { %v902_v47 = vadd.f32 %v901_v44, %v893_v37 }
 0x130   : > { %v646_v48 = vmul.f32 %v645_v46, %v638_v45 }
 0x131   : > { %v903_v49 = vmul.f32 0.7978846, %v902_v47 }
 0x132   : > { %v647_v51 = vpack.c.bf16 %v646_v48, %v646_v48 }
 0x133   : > { %2061 = vtanh.f32 %v903_v49 }
 0x134   : > { %1869 = vmatmul.mubr.msk.bf16.vlgmr.msra.gmra.mrb[0].mxu1 %vm687_vm3, %v647_v51 }
 0x135   : > { %1889 = vmatpush3.bf16.msra.mxu1 %v2055_v50  ;;  %1896 = vmatprep.mubr.msk.bf16.mxu1 %vm2193_vm0, %v2192_v0 }
 0x136   : > { %1890 = vmatprep.subr.bf16.mxu1 %v2192_v0 }
 0x139   : > { %1891 = vmatpush3.bf16.msra.mxu1 %v2056_v52 }
 0x13a   : > { %1892 = vmatprep.subr.bf16.mxu1 %v2192_v0 }
 0x13d   : > { %v2062_v54 = vpop.eup %2061  ;;  %1893 = vmatpush3.bf16.msra.mxu1 %v2057_v53 }
 0x13e   : > { %v905_v57 = vadd.f32 1.0, %v2062_v54  ;;  %1894 = vmatprep.subr.bf16.mxu1 %v2192_v0 }
 0x140   : > { %v906_v58 = vmul.f32 %v905_v57, %v898_v56 }
 0x141   : > { %1895 = vmatpush3.bf16.msra.mxu1 %v2058_v55 }
 0x142   : > { %v907_v59 = vpack.c.bf16 %v906_v58, %v906_v58  ;;  %1912 = vmatprep.subr.bf16.mxu1 %v2192_v0 }
 0x144   : > { %1897 = vmatmul.mubr.msk.bf16.vlgmr.msra.gmra.mrb[4].mxu1 %vm687_vm3, %v907_v59 }
 0x145   : > { %1914 = vmatprep.mubr.msk.bf16.mxu1 %vm2193_vm0, %v2192_v0 }
 0x207   : > { %v725_v61 = vpop.f32.mrb[0].mxu1 }
 0x208   : > { %v726_v62 = vadd.f32 %v1772_v60, %v725_v61  ;;  %v1870_v63 = vpop.f32.mrb[1].mxu1 }
 0x209   : > { %v728_v1 = vpop.f32.mrb[2].mxu1 }
 0x20a   : > { %v731_v2 = vpack.c.bf16 %v726_v62, %v726_v62  ;;  %v1871_v3 = vpop.f32.mrb[3].mxu1 }
 0x20c   : > { %810 = vst.msk [vmem:[#allocation2] sm:$0xf] %vm809_vm4, %v731_v2  ;;  %806 = vrot.lane.b32.xlu1 %v731_v2, %s2194_s20  ;;  %800 = vrot.lane.b32.xlu0 %v731_v2, %s2195_s27 }
 0x210   : > { %803 = vrot.lane.b32.xlu0 %v731_v2, %s2196_s26 }
 0x213   : > { %v1000_v4 = vld [vmem:[#allocation2] sm:$0xf] }
 0x214   : > { %v1013_v5 = vsel %vm1008_vm5, %v1000_v4, 0 }
 0x215   : > { %1901 = vmatpush3.bf16.xpose.msra.mxu0 %v1013_v5 }
 0x216   : > { %1906 = vmatprep.subr.bf16.mxu0 %v2192_v0 }
 0x217   : > { %v985_v7 = vpop.f32.mrb[4].mxu1 }
 0x218   : > { %v986_v8 = vadd.f32 %v1786_v6, %v985_v7  ;;  %v1898_v9 = vpop.f32.mrb[5].mxu1 }
 0x219   : > { %v988_v10 = vpop.f32.mrb[6].mxu1 }
 0x21a   : > { %v991_v11 = vmul.f32 0.5, %v986_v8  ;;  %v1899_v12 = vpop.f32.mrb[7].mxu1 }
 0x21c   : > { %v992_v13 = vpack.c.bf16 %v991_v11, %v991_v11 }
 0x21e   : > { %996 = vrot.lane.b32.xlu0 %v992_v13, %s2196_s26  ;;  %994 = vrot.lane.b32.xlu1 %v992_v13, %s2195_s27  ;;  %s1636_s27 = scalar_lea.sflag [#allocation6], %s544_s23 }
 0x21f   : > { %1903 = vmatmul.mubr.msk.bf16.vlgmr.msra.gmra.mrb[12].mxu0 %vm1008_vm5, %v992_v13 }
 0x220   : > { %1908 = vmatprep.mubr.msk.bf16.mxu0 %vm2193_vm0, %v2192_v0 }
 0x222   : > { %998 = vrot.lane.b32.xlu1 %v992_v13, %s2194_s20  ;;  %s2576_s20 = scalar_lea.hbm %s2639_s15, %s1806_s16 }
 0x27e   : > { %v807_v14 = vpop.permute.xlu1 %806  ;;  %v801_v15 = vpop.permute.xlu0 %800 }
 0x27f   : > { %813 = vst.msk [vmem:[#allocation2 + $0xc] sm:$0xf] %vm809_vm4, %v807_v14  ;;  %811 = vst.msk [vmem:[#allocation2 + $0x4] sm:$0xf] %vm809_vm4, %v801_v15 }
 0x282   : > { %v804_v16 = vpop.permute.xlu0 %803 }
 0x283   : > { %812 = vst.msk [vmem:[#allocation2 + $0x8] sm:$0xf] %vm809_vm4, %v804_v16 }
 0x286   : > { %v1001_v17 = vld [vmem:[#allocation2 + $0x4] sm:$0xf]  ;;  %v1003_v21 = vld [vmem:[#allocation2 + $0xc] sm:$0xf] }
 0x287   : > { %v1059_v18 = vsel %vm1008_vm5, %v1001_v17, 0  ;;  %v1151_v24 = vsel %vm1008_vm5, %v1003_v21, 0 }
 0x288   : > { %1907 = vmatpush3.bf16.xpose.msra.mxu0 %v1059_v18 }
 0x289   : > { %1918 = vmatprep.subr.bf16.mxu0 %v2192_v0 }
 0x28a   : > { %v1002_v19 = vld [vmem:[#allocation2 + $0x8] sm:$0xf] }
 0x28b   : > { %v1105_v20 = vsel %vm1008_vm5, %v1002_v19, 0 }
 0x28c   : > { %1913 = vmatpush3.bf16.xpose.msra.mxu1 %v1105_v20 }
 0x28d   : > { %1924 = vmatprep.subr.bf16.mxu1 %v2192_v0 }
 0x290   : > { %v995_v22 = vpop.permute.xlu1 %994  ;;  %v997_v25 = vpop.permute.xlu0 %996 }
 0x291   : > { %1909 = vmatmul.mubr.msk.bf16.vlgmr.msra.gmra.mrb[16].mxu0 %vm1008_vm5, %v995_v22 }
 0x292   : > { %1919 = vmatpush3.bf16.xpose.msra.mxu0 %v1151_v24  ;;  %1920 = vmatprep.mubr.msk.bf16.mxu0 %vm2193_vm0, %v2192_v0 }
 0x293   : > { %1915 = vmatmul.mubr.msk.bf16.vlgmr.msra.gmra.mrb[8].mxu1 %vm1008_vm5, %v997_v25  ;;  %1930 = vmatprep.subr.bf16.mxu0 %v2192_v0 }
 0x294   : > { %1925 = vmatpush3.bf16.msra.mxu1 %v1247_v26  ;;  %1926 = vmatprep.mubr.msk.bf16.mxu1 %vm2193_vm0, %v2192_v0  ;;  %v999_v27 = vpop.permute.xlu1 %998 }
 0x295   : > { %1936 = vmatprep.subr.bf16.mxu1 %v2192_v0 }
 0x299   : > { %1921 = vmatmul.mubr.msk.bf16.vlgmr.msra.gmra.mrb[20].mxu0 %vm1008_vm5, %v999_v27  ;;  %v1431_v27 = vld [vmem:[%s2637_s13] sm:$0xf] }
 0x29a   : > { %1932 = vmatprep.mubr.msk.bf16.mxu0 %vm2193_vm0, %v2192_v0 }
 0x2f2   : > { %v1049_v28 = vpop.f32.mrb[12].mxu0 }
 0x2f3   : > { %v1904_v29 = vpop.f32.mrb[13].mxu0  ;;  %v1194_v30 = vsel %vm1193_vm7, %v1049_v28, -inf }
 0x2f4   : > { %1195 = vmax.xlane.f32.xlu0 %v1194_v30  ;;  %v1052_v31 = vpop.f32.mrb[14].mxu0 }
 0x2f5   : > { %v1905_v32 = vpop.f32.mrb[15].mxu0  ;;  %v1439_v31 = vsel %vm1245_vm6, %v1431_v27, 0 }
 0x2f6   : > { %v1432_v32 = vld [vmem:[%s2637_s13 + $0x4] sm:$0xf] }
 0x364   : > { %v1095_v34 = vpop.f32.mrb[16].mxu0 }
 0x365   : > { %v1910_v35 = vpop.f32.mrb[17].mxu0  ;;  %v1197_v36 = vsel %vm1193_vm7, %v1095_v34, -inf }
 0x366   : > { %v1141_v37 = vpop.f32.mrb[8].mxu1  ;;  %1198 = vmax.xlane.f32.xlu1 %v1197_v36  ;;  %v1098_v38 = vpop.f32.mrb[18].mxu0  ;;  %v1433_v35 = vld [vmem:[%s2637_s13 + $0x8] sm:$0xf] }
 0x367   : > { %v1911_v39 = vpop.f32.mrb[19].mxu0  ;;  %v1916_v40 = vpop.f32.mrb[9].mxu1  ;;  %v1200_v41 = vsel %vm1193_vm7, %v1141_v37, -inf }
 0x368   : > { %v1144_v42 = vpop.f32.mrb[10].mxu1  ;;  %1201 = vmax.xlane.f32.xlu0 %v1200_v41  ;;  %v1531_v39 = vsel %vm1245_vm6, %v1433_v35, 0 }
 0x369   : > { %v1917_v43 = vpop.f32.mrb[11].mxu1  ;;  %v1434_v42 = vld [vmem:[%s2637_s13 + $0xc] sm:$0xf] }
 0x36c   : > { %v1187_v44 = vpop.f32.mrb[20].mxu0 }
 0x36d   : > { %v1922_v45 = vpop.f32.mrb[21].mxu0  ;;  %v1203_v46 = vsel %vm1193_vm7, %v1187_v44, -inf }
 0x36e   : > { %1204 = vmax.xlane.f32.xlu0 %v1203_v46  ;;  %v1190_v47 = vpop.f32.mrb[22].mxu0  ;;  %v1577_v46 = vsel %vm1245_vm6, %v1434_v42, 0 }
 0x36f   : > { %v1923_v48 = vpop.f32.mrb[23].mxu0 }
 0x377   : > { %815 = vrot.lane.b32.xlu1 %v2442_v33, %s2196_s26  ;;  %s2107_s26 = scalar_lea.vmem %s2578_s24, 128 }
 0x378   : > { %p2108_p8 = scmp.ne.s32.totalorder %s2578_s24, %s2107_s26 }
 0x37a   : > { %p2109_p11 = pnand %p2108_p8, %p2665_p10 }
 0x37c   : > { %p2110_p13 = pneg %p2109_p11 }
 0x381   : > { %v1196_v49 = vpop.xlane.xlu0 %1195 }
 0x382   : > { %v1206_v50 = vsub.f32 %v1049_v28, %v1196_v49 }
 0x384   : > { %v1210_v51 = vmul.f32 1.442695, %v1206_v50 }
 0x386   : > { %2063 = vpow2.f32 %v1210_v51 }
 0x390   : > { %v2064_v52 = vpop.eup %2063 }
 0x391   : > { %v1218_v53 = vsel %vm1193_vm7, %v2064_v52, 0.0 }
 0x39b   : > { %1219 = vadd.xlane.f32.xlu1 %v1218_v53 }
 0x3f3   : > { %v1199_v54 = vpop.xlane.xlu1 %1198 }
 0x3f4   : > { %v1207_v55 = vsub.f32 %v1095_v34, %v1199_v54  ;;  %v1485_v34 = vsel %vm1245_vm6, %v1432_v32, 0 }
 0x3f5   : > { %v1202_v56 = vpop.xlane.xlu0 %1201 }
 0x3f6   : > { %v1212_v57 = vmul.f32 1.442695, %v1207_v55  ;;  %v1208_v58 = vsub.f32 %v1141_v37, %v1202_v56 }
 0x3f7   : > { %v816_v59 = vpop.permute.xlu1 %815 }
 0x3f8   : > { %2065 = vpow2.f32 %v1212_v57  ;;  %v1214_v60 = vmul.f32 1.442695, %v1208_v58  ;;  %826 = vst.msk [vmem:[#allocation3 + $0x4] sm:$0xf] %vm824_vm2, %v816_v59 }
 0x3fa   : > { %2067 = vpow2.f32 %v1214_v60 }
 0x3fb   : > { %v1205_v61 = vpop.xlane.xlu0 %1204 }
 0x3fc   : > { %v1209_v62 = vsub.f32 %v1187_v44, %v1205_v61 }
 0x3fe   : > { %v1216_v63 = vmul.f32 1.442695, %v1209_v62 }
 0x3ff   : > { %v1005_v1 = vld [vmem:[#allocation3 + $0x4] sm:$0xf] }
 0x400   : > { %2069 = vpow2.f32 %v1216_v63  ;;  %v1293_v2 = vsel %vm1245_vm6, %v1005_v1, 0 }
 0x401   : > { %1931 = vmatpush3.bf16.msra.mxu0 %v1293_v2 }
 0x402   : > { %v2066_v3 = vpop.eup %2065  ;;  %1942 = vmatprep.subr.bf16.mxu0 %v2192_v0 }
 0x403   : > { %v1221_v4 = vsel %vm1193_vm7, %v2066_v3, 0.0 }
 0x404   : > { %v2068_v5 = vpop.eup %2067  ;;  %1222 = vadd.xlane.f32.xlu0 %v1221_v4 }
 0x405   : > { %v1224_v6 = vsel %vm1193_vm7, %v2068_v5, 0.0 }
 0x406   : > { %1225 = vadd.xlane.f32.xlu1 %v1224_v6 }
 0x40a   : > { %v2070_v7 = vpop.eup %2069 }
 0x40b   : > { %v1227_v8 = vsel %vm1193_vm7, %v2070_v7, 0.0 }
 0x40c   : > { %1228 = vadd.xlane.f32.xlu0 %v1227_v8 }
 0x417   : > { %821 = vrot.lane.b32.xlu1 %v2442_v33, %s2197_s18  ;;  %s2113_s18 = scalar_lea.vmem %s2112_s30, 256 }
 0x418   : > { %p2115_p3 = scmp.lt.s32.totalorder %s2113_s18, %s2107_s26 }
 0x41a   : > { %p2116_p5 = por %p2115_p3, %p2114_p1 }
 0x41c   : > { %p2117_p6 = pnand %p2116_p5, %p2110_p13 }
 0x422   : > { %818 = vrot.lane.b32.xlu0 %v2442_v33, %s2198_s17 }
 0x428   : > { %v1220_v9 = vpop.xlane.xlu1 %1219 }
 0x429   : > { %2071 = vrcp.f32 %v1220_v9 }
 0x433   : > { %v2072_v10 = vpop.eup %2071 }
 0x434   : > { %v1234_v11 = vmul.f32 %v2072_v10, %v2064_v52 }
 0x436   : > { %v1238_v12 = vpack.c.bf16 %v1234_v11, %v1234_v11 }
 0x438   : > { %1927 = vmatmul.mubr.msk.bf16.vlgmr.msra.gmra.mrb[12].mxu1 %vm1193_vm7, %v1238_v12 }
 0x439   : > { %1938 = vmatprep.mubr.msk.bf16.mxu1 %vm2193_vm0, %v2192_v0 }
 0x491   : > { %v1223_v13 = vpop.xlane.xlu0 %1222 }
 0x492   : > { %2073 = vrcp.f32 %v1223_v13 }
 0x493   : > { %v1226_v14 = vpop.xlane.xlu1 %1225 }
 0x494   : > { %2075 = vrcp.f32 %v1226_v14 }
 0x497   : > { %v822_v15 = vpop.permute.xlu1 %821 }
 0x498   : > { %828 = vst.msk [vmem:[#allocation3 + $0xc] sm:$0xf] %vm824_vm2, %v822_v15 }
 0x499   : > { %v1229_v16 = vpop.xlane.xlu0 %1228 }
 0x49a   : > { %2077 = vrcp.f32 %v1229_v16  ;;  %v1804_v16 = vld [vmem:[%s2638_s14] ss:$0 sm:$0xff] }
 0x49c   : > { %v2074_v33 = vpop.eup %2073 }
 0x49d   : > { %v1235_v17 = vmul.f32 %v2074_v33, %v2066_v3  ;;  %v819_v18 = vpop.permute.xlu0 %818 }
 0x49e   : > { %827 = vst.msk [vmem:[#allocation3 + $0x8] sm:$0xf] %vm824_vm2, %v819_v18  ;;  %v2076_v22 = vpop.eup %2075 }
 0x49f   : > { %v1239_v19 = vpack.c.bf16 %v1235_v17, %v1235_v17  ;;  %v1007_v20 = vld [vmem:[#allocation3 + $0xc] sm:$0xf]  ;;  %v1236_v24 = vmul.f32 %v2076_v22, %v2068_v5 }
 0x4a0   : > { %v1385_v21 = vsel %vm1245_vm6, %v1007_v20, 0 }
 0x4a1   : > { %1933 = vmatmul.mubr.msk.bf16.vlgmr.msra.gmra.mrb[24].mxu0 %vm1193_vm7, %v1239_v19  ;;  %v1240_v30 = vpack.c.bf16 %v1236_v24, %v1236_v24 }
 0x4a2   : > { %1943 = vmatpush3.bf16.msra.mxu0 %v1385_v21  ;;  %1944 = vmatprep.mubr.msk.bf16.mxu0 %vm2193_vm0, %v2192_v0 }
 0x4a3   : > { %1954 = vmatprep.subr.bf16.mxu0 %v2192_v0 }
 0x4a4   : > { %v2078_v23 = vpop.eup %2077 }
 0x4a5   : > { %v1237_v25 = vmul.f32 %v2078_v23, %v2070_v7  ;;  %v1006_v26 = vld [vmem:[#allocation3 + $0x8] sm:$0xf] }
 0x4a6   : > { %v1339_v28 = vsel %vm1245_vm6, %v1006_v26, 0 }
 0x4a7   : > { %1937 = vmatpush3.bf16.msra.mxu1 %v1339_v28  ;;  %v1241_v29 = vpack.c.bf16 %v1237_v25, %v1237_v25 }
 0x4a8   : > { %1948 = vmatprep.subr.bf16.mxu1 %v2192_v0 }
 0x4a9   : > { %1945 = vmatmul.mubr.msk.bf16.vlgmr.msra.gmra.mrb[28].mxu0 %vm1193_vm7, %v1241_v29 }
 0x4aa   : > { %1939 = vmatmul.mubr.msk.bf16.vlgmr.msra.gmra.mrb[16].mxu1 %vm1193_vm7, %v1240_v30  ;;  %1956 = vmatprep.mubr.msk.bf16.mxu0 %vm2193_vm0, %v2192_v0 }
 0x4ab   : > { %1949 = vmatpush3.bf16.msra.mxu1 %v1439_v31  ;;  %1950 = vmatprep.mubr.msk.bf16.mxu1 %vm2193_vm0, %v2192_v0 }
 0x4ac   : > { %1960 = vmatprep.subr.bf16.mxu1 %v2192_v0  ;;  %1955 = vmatpush3.bf16.msra.mxu0 %v1485_v34 }
 0x4ad   : > { %1966 = vmatprep.subr.bf16.mxu0 %v2192_v0 }
 0x50b   : > { %v1283_v36 = vpop.f32.mrb[12].mxu1 }
 0x50c   : > { %v1427_v37 = vpack.c.bf16 %v1283_v36, %v1283_v36  ;;  %v1928_v38 = vpop.f32.mrb[13].mxu1 }
 0x50d   : > { %v1286_v40 = vpop.f32.mrb[14].mxu1 }
 0x50e   : > { %v1929_v41 = vpop.f32.mrb[15].mxu1  ;;  %1951 = vmatmul.mubr.msk.bf16.vlgmr.msra.gmra.mrb[20].mxu1 %vm1193_vm7, %v1427_v37 }
 0x50f   : > { %1961 = vmatpush3.bf16.msra.mxu1 %v1531_v39  ;;  %1962 = vmatprep.mubr.msk.bf16.mxu1 %vm2193_vm0, %v2192_v0 }
 0x574   : > { %v1329_v43 = vpop.f32.mrb[24].mxu0 }
 0x575   : > { %v1428_v44 = vpack.c.bf16 %v1329_v43, %v1329_v43  ;;  %v1934_v45 = vpop.f32.mrb[25].mxu0 }
 0x576   : > { %v1332_v47 = vpop.f32.mrb[26].mxu0 }
 0x577   : > { %v1935_v48 = vpop.f32.mrb[27].mxu0  ;;  %1957 = vmatmul.mubr.msk.bf16.vlgmr.msra.gmra.mrb[32].mxu0 %vm1193_vm7, %v1428_v44 }
 0x578   : > { %1967 = vmatpush3.bf16.msra.mxu0 %v1577_v46  ;;  %1968 = vmatprep.mubr.msk.bf16.mxu0 %vm2193_vm0, %v2192_v0 }
 0x57c   : > { %v1421_v49 = vpop.f32.mrb[28].mxu0 }
 0x57d   : > { %v1430_v50 = vpack.c.bf16 %v1421_v49, %v1421_v49  ;;  %v1375_v51 = vpop.f32.mrb[16].mxu1  ;;  %v1946_v52 = vpop.f32.mrb[29].mxu0 }
 0x57e   : > { %v1429_v53 = vpack.c.bf16 %v1375_v51, %v1375_v51  ;;  %v1940_v54 = vpop.f32.mrb[17].mxu1  ;;  %v1424_v55 = vpop.f32.mrb[30].mxu0 }
 0x57f   : > { %v1378_v56 = vpop.f32.mrb[18].mxu1  ;;  %v1947_v57 = vpop.f32.mrb[31].mxu0  ;;  %1969 = vmatmul.mubr.msk.bf16.vlgmr.msra.gmra.mrb[36].mxu0 %vm1193_vm7, %v1430_v50 }
 0x580   : > { %v1941_v58 = vpop.f32.mrb[19].mxu1  ;;  %1963 = vmatmul.mubr.msk.bf16.vlgmr.msra.gmra.mrb[24].mxu1 %vm1193_vm7, %v1429_v53 }
 0x5e1   : > { %v1475_v59 = vpop.f32.mrb[20].mxu1 }
 0x5e2   : > { %v1952_v60 = vpop.f32.mrb[21].mxu1  ;;  %v1619_v63 = vsel %vm594_vm1, %v1475_v59, 0.0 }
 0x5e3   : > { %v1478_v61 = vpop.f32.mrb[22].mxu1 }
 0x5e4   : > { %v1953_v62 = vpop.f32.mrb[23].mxu1 }
 0x64a   : > { %v1521_v0 = vpop.f32.mrb[32].mxu0 }
 0x64b   : > { %v1620_v1 = vsel %vm594_vm1, %v1521_v0, 0.0  ;;  %v1958_v2 = vpop.f32.mrb[33].mxu0 }
 0x64c   : > { %v1621_v3 = vadd.f32 %v1620_v1, %v1619_v63  ;;  %v1524_v4 = vpop.f32.mrb[34].mxu0 }
 0x64d   : > { %v1959_v5 = vpop.f32.mrb[35].mxu0 }
 0x652   : > { %v1613_v6 = vpop.f32.mrb[36].mxu0 }
 0x653   : > { %v1567_v7 = vpop.f32.mrb[24].mxu1  ;;  %v1970_v8 = vpop.f32.mrb[37].mxu0  ;;  %v1624_v15 = vsel %vm594_vm1, %v1613_v6, 0.0 }
 0x654   : > { %v1622_v9 = vsel %vm594_vm1, %v1567_v7, 0.0  ;;  %v1964_v10 = vpop.f32.mrb[25].mxu1  ;;  %v1616_v11 = vpop.f32.mrb[38].mxu0 }
 0x655   : > { %v1623_v12 = vadd.f32 %v1622_v9, %v1621_v3  ;;  %v1570_v13 = vpop.f32.mrb[26].mxu1  ;;  %v1971_v14 = vpop.f32.mrb[39].mxu0 }
 0x656   : > { %v1965_v33 = vpop.f32.mrb[27].mxu1 }
 0x657   : > { %v1625_v17 = vadd.f32 %v1624_v15, %v1623_v12 }
 0x659   : > { %v1633_v18 = vadd.f32 %v1804_v16, %v1625_v17 }
 0x65b   : > { %1634 = vst.msk [vmem:[%s546_s29] sm:$0xff] %vm594_vm1, %v1633_v18 }
 0x65c   : > { %2120 = shalt.err (!%p2117_p6)
}
 0x65d   : > { %s2121_s23 = scalar_lea.hbm %s2576_s20, 128  ;;  %s2125_s29 = scalar_lea.hbm %s2639_s15, 256 }
 0x65e   : > { %p2122_p7 = scmp.ne.s32.totalorder %s2576_s20, %s2121_s23  ;;  %p2126_p0 = scmp.lt.u32.totalorder %s2576_s20, %s2639_s15 }
 0x65f   : > { %p2127_p2 = scmp.lt.u32.totalorder %s2125_s29, %s2121_s23  ;;  %p2129_p8 = scmp.lt.u32.totalorder %s2121_s23, %s2576_s20 }
 0x660   : > { %p2123_p9 = pnand %p2122_p7, %p2665_p10 }
 0x661   : > { %p2128_p4 = por %p2127_p2, %p2126_p0 }
 0x662   : > { %p2124_p12 = pneg %p2123_p9 }
 0x663   : > { %p2130_p11 = por %p2129_p8, %p2128_p4 }
 0x665   : > { %p2131_p13 = pnand %p2130_p11, %p2124_p12 }
 0x667   : > { %2134 = shalt.err (!%p2131_p13)
}
 0x668   : > { %1976 = dma.vmem_to_hbm [thread:$0]  (%p2665_p10), %s2578_s24, 128, %s2576_s20, %s1636_s27  }
 0x669 PF: > { %s2666_s26 = sld [smem:[#allocation13_spill]]  ;;  %s2667_s21 = sld [smem:[#allocation10_spill]] }
 0x66a   : > { %s2668_s30 = sld [smem:[#allocation15_spill]] }
 0x66f   : > { %p1988_p1 = scmp.ge.s32.totalorder %s2666_s26, 2  ;;  %s1662_s18 = sand.u32 1, %s2667_s21  }
 0x670   : > { %p2669_p3 = scmp.ne.s32.totalorder %s2668_s30, 0  ;;  %s1663_s17 = scalar_lea.sflag [#allocation6], %s1662_s18 }
 0x672   : > { %p1983_p5 = pnand %p1988_p1, %p2669_p3 }
 0x674   : > { %2164 = dma.done.wait (!%p1983_p5), %s1663_s17, 128  }
 0x675   : > { %2166 = vsyncadd (!%p1983_p5), %s1663_s17, 4294967168  ;;  %s29_s23 = sadd.s32 1, %s2666_s26   ;;  %s2670_s16 = sld [smem:[#allocation11_spill]] }
 0x676   : > { %p26_p6 = scmp.ge.s32.totalorder %s29_s23, 4   ;;  %s2671_s20 = sld [smem:[#allocation16_spill]] }
 0x677   : > { %s2672_s21 = sld [smem:[#allocation12_spill]]  ;;  %s2673_s22 = sld [smem:[#allocation14_spill]] }
 0x678   : > { %s2674_s18 = smov %s2173_s19  ;;  %28 = sbr.rel (!%p26_p6) target bundleno = 5 (0x5), region = 130 }
 0x67b   : > { %s2675_s19 = smov %s2670_s16 }
 0x67f   :  { %1668 = vsyncpa [#allocation5], 1 }
 0x680   :  { %1670 = vsyncpa [#allocation5 + $0x1], 1 }
 0x681   :  { %1671 = vsyncpa [#allocation6], 1 }
 0x682   :  { %1673 = vsyncpa [#allocation6 + $0x1], 1 }

</bundles_post_ra>
